<compile_context>
chip_gen: v7x
topology: tpu7x:2x2x1
jax: 0.10.0
libtpu: 0.0.40
codegen_flags: <defaults>
</compile_context>

<pallas_src>
import functools

import jax
import jax.numpy as jnp
from jax.experimental import pallas as pl
from jax.experimental.pallas import tpu as pltpu

LANES = 128  # TPU vreg lane width; rays are laid out (rows, 128) lane-dense.


def _collide_refract_kernel(pv_ref, geo_ref, msk_ref, *,
                            R, diameter, eta, n_rays, rows_pb):
    """Sphere-cap collision + vector-Snell refraction, component-split SoA.

    pv_ref : (6, rows_pb, 128) f32  -- [Px, Py, Pz, Vx, Vy, Vz]
    geo_ref: (6, rows_pb, 128) f32  -- [CPx, CPy, CPz, RVx, RVy, RVz]
    msk_ref: (rows_pb, 128)    i8   -- bit0 valid_collision, bit1 valid_refraction
    """
    px = pv_ref[0, :, :]
    py = pv_ref[1, :, :]
    pz = pv_ref[2, :, :]
    vx = pv_ref[3, :, :]
    vy = pv_ref[4, :, :]
    vz = pv_ref[5, :, :]

    # ---- collision with spherical cap: apex at origin, center C=(R,0,0) ----
    ocx = px - R
    ocy = py
    ocz = pz
    b = ocx * vx + ocy * vy + ocz * vz
    c = ocx * ocx + ocy * ocy + ocz * ocz - R * R
    disc = b * b - c
    hit = disc >= 0.0
    sq = jnp.sqrt(jnp.maximum(disc, 0.0))          # EUP
    s_r = 1.0 if R >= 0.0 else -1.0                # pick the apex-side root
    t = -b - s_r * sq
    # TODO(synk): forward-hit (t >= 0) is not enforced, matching the assumed
    #             CollisionSurface/intersect semantics of the reference.

    xx = px + t * vx
    xy = py + t * vy
    xz = pz + t * vz

    # aperture check on the transverse radius (optical axis = x)
    r2 = xy * xy + xz * xz
    valid_collision = jnp.logical_and(hit, r2 <= (0.5 * diameter) ** 2)

    # signed unit normal at the collision point (1/R folded at trace time)
    inv_R = 1.0 / R
    nx = (xx - R) * inv_R
    ny = xy * inv_R
    nz = xz * inv_R

    # ---- refraction (vector Snell, critical_angle='reflect') ---------------
    cosi = -(nx * vx + ny * vy + nz * vz)
    sgn = jnp.where(cosi < 0.0, -1.0, 1.0)         # orient normal against ray
    nx = nx * sgn
    ny = ny * sgn
    nz = nz * sgn
    cosi = cosi * sgn
    # eta stays n1/n2 (data.material -> element material) regardless of which
    # side the ray hits, matching refraction(data.V, normals, n1, n2).
    k = 1.0 - eta * eta * (1.0 - cosi * cosi)
    tir = k < 0.0
    sqrtk = jnp.sqrt(jnp.maximum(k, 0.0))          # EUP
    coef = eta * cosi - sqrtk
    rfx = eta * vx + coef * nx
    rfy = eta * vy + coef * ny
    rfz = eta * vz + coef * nz
    two_cosi = 2.0 * cosi
    rlx = vx + two_cosi * nx
    rly = vy + two_cosi * ny
    rlz = vz + two_cosi * nz
    ox = jnp.where(tir, rlx, rfx)
    oy = jnp.where(tir, rly, rfy)
    oz = jnp.where(tir, rlz, rfz)
    valid_refraction = jnp.logical_not(tir)

    # ---- mask lanes past the real ray count (layout/tiling padding) --------
    row = jax.lax.broadcasted_iota(jnp.int32, (rows_pb, LANES), 0)
    lane = jax.lax.broadcasted_iota(jnp.int32, (rows_pb, LANES), 1)
    gidx = (pl.program_id(0) * rows_pb + row) * LANES + lane
    in_range = gidx < n_rays
    valid_collision = jnp.logical_and(valid_collision, in_range)
    valid_refraction = jnp.logical_and(valid_refraction, in_range)

    geo_ref[0, :, :] = xx
    geo_ref[1, :, :] = xy
    geo_ref[2, :, :] = xz
    geo_ref[3, :, :] = ox
    geo_ref[4, :, :] = oy
    geo_ref[5, :, :] = oz
    msk_ref[...] = (valid_collision.astype(jnp.int32)
                    + 2 * valid_refraction.astype(jnp.int32)).astype(jnp.int8)


@functools.partial(
    jax.jit,
    static_argnames=("R", "diameter", "n1", "n2", "rays_per_block"))
def refractive_surface_forward_frame(P, V, *, R=2.0, diameter=1.5,
                                     n1=1.0, n2=1.5, rays_per_block=65536):
    """Jittable full-frame part of RefractiveSurface.forward.

    P, V : (N, 3) ray origins / unit directions (== data.P, data.V).
    Returns (collision_points, refracted, valid_collision, valid_refraction),
    all full-frame (length N).  tir='absorb' compaction (dynamic shape) is
    applied outside jit by refractive_surface_forward.
    """
    N, D = P.shape
    assert D == 3, "kernel is specialized to dim=3 optics"

    # ---- pack to component-split SoA layout (one fused XLA layout pass) ----
    rows_needed = pl.cdiv(N, LANES)
    # tile size in rows: big for throughput, clamped (to a multiple of 32,
    # which keeps the int8 mask block sublane-packable) for small inputs.
    rows_pb = max((int(rays_per_block) // LANES) // 32 * 32, 32)
    rows_pb = min(rows_pb, pl.cdiv(rows_needed, 32) * 32)
    rows_padded = pl.cdiv(rows_needed, rows_pb) * rows_pb
    n_pad = rows_padded * LANES

    pv = jnp.concatenate([jnp.asarray(P, jnp.float32),
                          jnp.asarray(V, jnp.float32)], axis=1)     # (N, 6)
    pv = jnp.pad(pv, ((0, n_pad - N), (0, 0)))                      # (Npad, 6)
    packed = pv.T.reshape(6, rows_padded, LANES)                    # (6, rows, 128)

    kernel = functools.partial(
        _collide_refract_kernel, R=float(R), diameter=float(diameter),
        eta=float(n1) / float(n2), n_rays=int(N), rows_pb=int(rows_pb))

    geo, msk = pl.pallas_call(
        kernel,
        out_shape=(
            jax.ShapeDtypeStruct((6, rows_padded, LANES), jnp.float32),
            jax.ShapeDtypeStruct((rows_padded, LANES), jnp.int8),
        ),
        grid_spec=pltpu.PrefetchScalarGridSpec(
            num_scalar_prefetch=0,
            grid=(rows_padded // rows_pb,),
            in_specs=[pl.BlockSpec((6, rows_pb, LANES), lambda i: (0, i, 0))],
            out_specs=(pl.BlockSpec((6, rows_pb, LANES), lambda i: (0, i, 0)),
                       pl.BlockSpec((rows_pb, LANES), lambda i: (i, 0))),
        ),
        compiler_params=pltpu.CompilerParams(
            dimension_semantics=("parallel",)),
    )(packed)

    geo_flat = geo.reshape(6, n_pad)
    collision_points = geo_flat[0:3, :N].T          # (N, 3)
    refracted = geo_flat[3:6, :N].T                 # (N, 3)
    mflat = msk.reshape(n_pad)[:N]
    valid_collision = (mflat & 1).astype(bool)
    valid_refraction = (mflat & 2).astype(bool)
    return collision_points, refracted, valid_collision, valid_refraction


def refractive_surface_forward(P, V, *, R=2.0, diameter=1.5, n1=1.0, n2=1.5,
                               rays_per_block=65536):
    """RefractiveSurface.forward tensor semantics (tir='absorb', miss='absorb').

    Returns (new_P, new_V, valid_refraction).  The boolean compaction has a
    data-dependent shape, so it runs eagerly outside jit; jit users should call
    refractive_surface_forward_frame and keep the masks instead.
    """
    N = P.shape[0]
    if N == 0:  # matches the data.P.numel() == 0 early-return branch
        return P, V, jnp.ones((0,), jnp.bool_)
    cp, rv, vc, vr = refractive_surface_forward_frame(
        P, V, R=R, diameter=diameter, n1=n1, n2=n2,
        rays_per_block=rays_per_block)
    both_valid = jnp.logical_and(vc, vr)
    new_P = cp[both_valid]
    new_V = rv[both_valid]
    return new_P, new_V, vr


if __name__ == "__main__":
    key = jax.random.PRNGKey(0)
    k1, k2 = jax.random.split(key)

    N, D = 256, 3
    # rays start at x = -1 with small transverse offsets, travelling ~+x
    yz = 0.4 * jax.random.uniform(k1, (N, D - 1), minval=-1.0, maxval=1.0)
    P = jnp.concatenate([-jnp.ones((N, 1)), yz], axis=1).astype(jnp.float32)
    dirs = jnp.concatenate(
        [jnp.ones((N, 1)), 0.05 * jax.random.normal(k2, (N, D - 1))], axis=1)
    V = (dirs / jnp.linalg.norm(dirs, axis=1, keepdims=True)).astype(jnp.float32)

    R, diameter, n1, n2 = 2.0, 1.5, 1.0, 1.5

    cp, rv, vc, vr = refractive_surface_forward_frame(
        P, V, R=R, diameter=diameter, n1=n1, n2=n2)
    jax.block_until_ready((cp, rv, vc, vr))

    # ---- pure-JAX full-frame reference (same math) for a sanity check ------
    C = jnp.array([R, 0.0, 0.0], jnp.float32)
    OC = P - C
    b = jnp.sum(OC * V, axis=1)
    c = jnp.sum(OC * OC, axis=1) - R * R
    disc = b * b - c
    t = -b - (1.0 if R >= 0 else -1.0) * jnp.sqrt(jnp.maximum(disc, 0.0))
    X = P + t[:, None] * V
    r2 = X[:, 1] ** 2 + X[:, 2] ** 2
    vc_ref = (disc >= 0) & (r2 <= (0.5 * diameter) ** 2)
    Nrm = (X - C) / R
    cosi = -jnp.sum(Nrm * V, axis=1)
    sgn = jnp.where(cosi < 0, -1.0, 1.0)
    Nrm = Nrm * sgn[:, None]
    cosi = cosi * sgn
    eta = n1 / n2
    kk = 1.0 - eta * eta * (1.0 - cosi * cosi)
    tir = kk < 0
    rf = eta * V + (eta * cosi - jnp.sqrt(jnp.maximum(kk, 0.0)))[:, None] * Nrm
    rl = V + (2.0 * cosi)[:, None] * Nrm
    rv_ref = jnp.where(tir[:, None], rl, rf)

    assert bool(jnp.array_equal(vc, vc_ref)), "valid_collision mismatch"
    assert bool(jnp.array_equal(vr, ~tir)), "valid_refraction mismatch"
    assert bool(jnp.allclose(cp, X, atol=1e-4)), "collision point mismatch"
    assert bool(jnp.allclose(rv, rv_ref, atol=1e-4)), "refracted dir mismatch"

    # module-level return (tir='absorb'): compaction done eagerly outside jit
    new_P, new_V, valid_refraction = refractive_surface_forward(
        P, V, R=R, diameter=diameter, n1=n1, n2=n2)
    jax.block_until_ready((new_P, new_V, valid_refraction))
    print("KERNEL_OK")
</pallas_src>

<mosaic_0001>
module attributes {stable_mosaic.version = 11 : i64} {
  func.func @_collide_refract_kernel(%arg0: i32, %arg1: memref<6x32x128xf32, #tpu.memory_space<vmem>>, %arg2: memref<6x32x128xf32, #tpu.memory_space<vmem>>, %arg3: memref<32x128xi8, #tpu.memory_space<vmem>>) attributes {dimension_semantics = [#tpu.dimension_semantics<parallel>], iteration_bounds = array<i64: 1>, scalar_prefetch = 0 : i64, scratch_operands = 0 : i64, tpu.core_type = #tpu.core_type<tc>, window_params = [{transform_indices = @transform_0, window_bounds = array<i64: 6, 32, 128>}, {transform_indices = @transform_1, window_bounds = array<i64: 6, 32, 128>}, {transform_indices = @transform_2, window_bounds = array<i64: 32, 128>}]} {
    %c0 = arith.constant 0 : index
    %c0_0 = arith.constant 0 : index
    %c0_1 = arith.constant 0 : index
    %0 = vector.load %arg1[%c0, %c0_0, %c0_1] : memref<6x32x128xf32, #tpu.memory_space<vmem>>, vector<1x32x128xf32>
    %1 = vector.shape_cast %0 : vector<1x32x128xf32> to vector<32x128xf32>
    %c1 = arith.constant 1 : index
    %c0_2 = arith.constant 0 : index
    %c0_3 = arith.constant 0 : index
    %2 = vector.load %arg1[%c1, %c0_2, %c0_3] : memref<6x32x128xf32, #tpu.memory_space<vmem>>, vector<1x32x128xf32>
    %3 = vector.shape_cast %2 : vector<1x32x128xf32> to vector<32x128xf32>
    %c2 = arith.constant 2 : index
    %c0_4 = arith.constant 0 : index
    %c0_5 = arith.constant 0 : index
    %4 = vector.load %arg1[%c2, %c0_4, %c0_5] : memref<6x32x128xf32, #tpu.memory_space<vmem>>, vector<1x32x128xf32>
    %5 = vector.shape_cast %4 : vector<1x32x128xf32> to vector<32x128xf32>
    %c3 = arith.constant 3 : index
    %c0_6 = arith.constant 0 : index
    %c0_7 = arith.constant 0 : index
    %6 = vector.load %arg1[%c3, %c0_6, %c0_7] : memref<6x32x128xf32, #tpu.memory_space<vmem>>, vector<1x32x128xf32>
    %7 = vector.shape_cast %6 : vector<1x32x128xf32> to vector<32x128xf32>
    %c4 = arith.constant 4 : index
    %c0_8 = arith.constant 0 : index
    %c0_9 = arith.constant 0 : index
    %8 = vector.load %arg1[%c4, %c0_8, %c0_9] : memref<6x32x128xf32, #tpu.memory_space<vmem>>, vector<1x32x128xf32>
    %9 = vector.shape_cast %8 : vector<1x32x128xf32> to vector<32x128xf32>
    %c5 = arith.constant 5 : index
    %c0_10 = arith.constant 0 : index
    %c0_11 = arith.constant 0 : index
    %10 = vector.load %arg1[%c5, %c0_10, %c0_11] : memref<6x32x128xf32, #tpu.memory_space<vmem>>, vector<1x32x128xf32>
    %11 = vector.shape_cast %10 : vector<1x32x128xf32> to vector<32x128xf32>
    %cst = arith.constant 2.000000e+00 : f32
    %12 = vector.broadcast %cst : f32 to vector<32x128xf32>
    %13 = arith.subf %1, %12 : vector<32x128xf32>
    %14 = arith.mulf %13, %7 : vector<32x128xf32>
    %15 = arith.mulf %3, %9 : vector<32x128xf32>
    %16 = arith.addf %14, %15 : vector<32x128xf32>
    %17 = arith.mulf %5, %11 : vector<32x128xf32>
    %18 = arith.addf %16, %17 : vector<32x128xf32>
    %19 = arith.mulf %13, %13 : vector<32x128xf32>
    %20 = arith.mulf %3, %3 : vector<32x128xf32>
    %21 = arith.addf %19, %20 : vector<32x128xf32>
    %22 = arith.mulf %5, %5 : vector<32x128xf32>
    %23 = arith.addf %21, %22 : vector<32x128xf32>
    %cst_12 = arith.constant 4.000000e+00 : f32
    %24 = vector.broadcast %cst_12 : f32 to vector<32x128xf32>
    %25 = arith.subf %23, %24 : vector<32x128xf32>
    %26 = arith.mulf %18, %18 : vector<32x128xf32>
    %27 = arith.subf %26, %25 : vector<32x128xf32>
    %cst_13 = arith.constant 0.000000e+00 : f32
    %28 = vector.broadcast %cst_13 : f32 to vector<32x128xf32>
    %29 = arith.cmpf oge, %27, %28 : vector<32x128xf32>
    %cst_14 = arith.constant 0.000000e+00 : f32
    %30 = vector.broadcast %cst_14 : f32 to vector<32x128xf32>
    %31 = arith.maximumf %27, %30 : vector<32x128xf32>
    %32 = math.sqrt %31 : vector<32x128xf32>
    %cst_15 = arith.constant 0.000000e+00 : f32
    %33 = vector.broadcast %cst_15 : f32 to vector<32x128xf32>
    %34 = arith.subf %33, %18 : vector<32x128xf32>
    %cst_16 = arith.constant 1.000000e+00 : f32
    %35 = vector.broadcast %cst_16 : f32 to vector<32x128xf32>
    %36 = arith.mulf %35, %32 : vector<32x128xf32>
    %37 = arith.subf %34, %36 : vector<32x128xf32>
    %38 = arith.mulf %37, %7 : vector<32x128xf32>
    %39 = arith.addf %1, %38 : vector<32x128xf32>
    %40 = arith.mulf %37, %9 : vector<32x128xf32>
    %41 = arith.addf %3, %40 : vector<32x128xf32>
    %42 = arith.mulf %37, %11 : vector<32x128xf32>
    %43 = arith.addf %5, %42 : vector<32x128xf32>
    %44 = arith.mulf %41, %41 : vector<32x128xf32>
    %45 = arith.mulf %43, %43 : vector<32x128xf32>
    %46 = arith.addf %44, %45 : vector<32x128xf32>
    %cst_17 = arith.constant 5.625000e-01 : f32
    %47 = vector.broadcast %cst_17 : f32 to vector<32x128xf32>
    %48 = arith.cmpf ole, %46, %47 : vector<32x128xf32>
    %49 = arith.andi %29, %48 : vector<32x128xi1>
    %cst_18 = arith.constant 2.000000e+00 : f32
    %50 = vector.broadcast %cst_18 : f32 to vector<32x128xf32>
    %51 = arith.subf %39, %50 : vector<32x128xf32>
    %cst_19 = arith.constant 5.000000e-01 : f32
    %52 = vector.broadcast %cst_19 : f32 to vector<32x128xf32>
    %53 = arith.mulf %51, %52 : vector<32x128xf32>
    %cst_20 = arith.constant 5.000000e-01 : f32
    %54 = vector.broadcast %cst_20 : f32 to vector<32x128xf32>
    %55 = arith.mulf %41, %54 : vector<32x128xf32>
    %cst_21 = arith.constant 5.000000e-01 : f32
    %56 = vector.broadcast %cst_21 : f32 to vector<32x128xf32>
    %57 = arith.mulf %43, %56 : vector<32x128xf32>
    %58 = arith.mulf %53, %7 : vector<32x128xf32>
    %59 = arith.mulf %55, %9 : vector<32x128xf32>
    %60 = arith.addf %58, %59 : vector<32x128xf32>
    %61 = arith.mulf %57, %11 : vector<32x128xf32>
    %62 = arith.addf %60, %61 : vector<32x128xf32>
    %cst_22 = arith.constant 0.000000e+00 : f32
    %63 = vector.broadcast %cst_22 : f32 to vector<32x128xf32>
    %64 = arith.subf %63, %62 : vector<32x128xf32>
    %cst_23 = arith.constant 0.000000e+00 : f32
    %65 = vector.broadcast %cst_23 : f32 to vector<32x128xf32>
    %66 = arith.cmpf olt, %64, %65 : vector<32x128xf32>
    %cst_24 = arith.constant -1.000000e+00 : f32
    %cst_25 = arith.constant 1.000000e+00 : f32
    %67 = vector.broadcast %cst_24 : f32 to vector<32x128xf32>
    %68 = vector.broadcast %cst_25 : f32 to vector<32x128xf32>
    %69 = arith.select %66, %67, %68 : vector<32x128xi1>, vector<32x128xf32>
    %70 = arith.mulf %53, %69 : vector<32x128xf32>
    %71 = arith.mulf %55, %69 : vector<32x128xf32>
    %72 = arith.mulf %57, %69 : vector<32x128xf32>
    %73 = arith.mulf %64, %69 : vector<32x128xf32>
    %74 = arith.mulf %73, %73 : vector<32x128xf32>
    %cst_26 = arith.constant 1.000000e+00 : f32
    %75 = vector.broadcast %cst_26 : f32 to vector<32x128xf32>
    %76 = arith.subf %75, %74 : vector<32x128xf32>
    %cst_27 = arith.constant 0.444444448 : f32
    %77 = vector.broadcast %cst_27 : f32 to vector<32x128xf32>
    %78 = arith.mulf %77, %76 : vector<32x128xf32>
    %cst_28 = arith.constant 1.000000e+00 : f32
    %79 = vector.broadcast %cst_28 : f32 to vector<32x128xf32>
    %80 = arith.subf %79, %78 : vector<32x128xf32>
    %cst_29 = arith.constant 0.000000e+00 : f32
    %81 = vector.broadcast %cst_29 : f32 to vector<32x128xf32>
    %82 = arith.cmpf olt, %80, %81 : vector<32x128xf32>
    %cst_30 = arith.constant 0.000000e+00 : f32
    %83 = vector.broadcast %cst_30 : f32 to vector<32x128xf32>
    %84 = arith.maximumf %80, %83 : vector<32x128xf32>
    %85 = math.sqrt %84 : vector<32x128xf32>
    %cst_31 = arith.constant 0.666666686 : f32
    %86 = vector.broadcast %cst_31 : f32 to vector<32x128xf32>
    %87 = arith.mulf %86, %73 : vector<32x128xf32>
    %88 = arith.subf %87, %85 : vector<32x128xf32>
    %cst_32 = arith.constant 0.666666686 : f32
    %89 = vector.broadcast %cst_32 : f32 to vector<32x128xf32>
    %90 = arith.mulf %89, %7 : vector<32x128xf32>
    %91 = arith.mulf %88, %70 : vector<32x128xf32>
    %92 = arith.addf %90, %91 : vector<32x128xf32>
    %cst_33 = arith.constant 0.666666686 : f32
    %93 = vector.broadcast %cst_33 : f32 to vector<32x128xf32>
    %94 = arith.mulf %93, %9 : vector<32x128xf32>
    %95 = arith.mulf %88, %71 : vector<32x128xf32>
    %96 = arith.addf %94, %95 : vector<32x128xf32>
    %cst_34 = arith.constant 0.666666686 : f32
    %97 = vector.broadcast %cst_34 : f32 to vector<32x128xf32>
    %98 = arith.mulf %97, %11 : vector<32x128xf32>
    %99 = arith.mulf %88, %72 : vector<32x128xf32>
    %100 = arith.addf %98, %99 : vector<32x128xf32>
    %cst_35 = arith.constant 2.000000e+00 : f32
    %101 = vector.broadcast %cst_35 : f32 to vector<32x128xf32>
    %102 = arith.mulf %101, %73 : vector<32x128xf32>
    %103 = arith.mulf %102, %70 : vector<32x128xf32>
    %104 = arith.addf %7, %103 : vector<32x128xf32>
    %105 = arith.mulf %102, %71 : vector<32x128xf32>
    %106 = arith.addf %9, %105 : vector<32x128xf32>
    %107 = arith.mulf %102, %72 : vector<32x128xf32>
    %108 = arith.addf %11, %107 : vector<32x128xf32>
    %109 = arith.select %82, %104, %92 : vector<32x128xi1>, vector<32x128xf32>
    %110 = arith.select %82, %106, %96 : vector<32x128xi1>, vector<32x128xf32>
    %111 = arith.select %82, %108, %100 : vector<32x128xi1>, vector<32x128xf32>
    %cst_36 = arith.constant dense<true> : vector<32x128xi1>
    %112 = arith.xori %82, %cst_36 : vector<32x128xi1>
    %113 = tpu.iota {dimensions = array<i32: 0>} : vector<32x128xi32>
    %114 = tpu.iota {dimensions = array<i32: 1>} : vector<32x128xi32>
    %c32_i32 = arith.constant 32 : i32
    %115 = arith.muli %arg0, %c32_i32 : i32
    %116 = vector.broadcast %115 : i32 to vector<32x128xi32>
    %117 = arith.addi %116, %113 : vector<32x128xi32>
    %c128_i32 = arith.constant 128 : i32
    %118 = vector.broadcast %c128_i32 : i32 to vector<32x128xi32>
    %119 = arith.muli %117, %118 : vector<32x128xi32>
    %120 = arith.addi %119, %114 : vector<32x128xi32>
    %c256_i32 = arith.constant 256 : i32
    %121 = vector.broadcast %c256_i32 : i32 to vector<32x128xi32>
    %122 = arith.cmpi slt, %120, %121 : vector<32x128xi32>
    %123 = arith.andi %49, %122 : vector<32x128xi1>
    %124 = arith.andi %112, %122 : vector<32x128xi1>
    %c0_37 = arith.constant 0 : index
    %c0_38 = arith.constant 0 : index
    %c0_39 = arith.constant 0 : index
    %125 = vector.load %arg2[%c0_37, %c0_38, %c0_39] : memref<6x32x128xf32, #tpu.memory_space<vmem>>, vector<1x32x128xf32>
    %126 = vector.shape_cast %125 : vector<1x32x128xf32> to vector<32x128xf32>
    %127 = vector.shape_cast %39 : vector<32x128xf32> to vector<1x32x128xf32>
    tpu.vector_store %arg2[%c0_37, %c0_38, %c0_39], %127 {strides = array<i32>} : memref<6x32x128xf32, #tpu.memory_space<vmem>>, vector<1x32x128xf32>,
    %c1_40 = arith.constant 1 : index
    %c0_41 = arith.constant 0 : index
    %c0_42 = arith.constant 0 : index
    %128 = vector.load %arg2[%c1_40, %c0_41, %c0_42] : memref<6x32x128xf32, #tpu.memory_space<vmem>>, vector<1x32x128xf32>
    %129 = vector.shape_cast %128 : vector<1x32x128xf32> to vector<32x128xf32>
    %130 = vector.shape_cast %41 : vector<32x128xf32> to vector<1x32x128xf32>
    tpu.vector_store %arg2[%c1_40, %c0_41, %c0_42], %130 {strides = array<i32>} : memref<6x32x128xf32, #tpu.memory_space<vmem>>, vector<1x32x128xf32>,
    %c2_43 = arith.constant 2 : index
    %c0_44 = arith.constant 0 : index
    %c0_45 = arith.constant 0 : index
    %131 = vector.load %arg2[%c2_43, %c0_44, %c0_45] : memref<6x32x128xf32, #tpu.memory_space<vmem>>, vector<1x32x128xf32>
    %132 = vector.shape_cast %131 : vector<1x32x128xf32> to vector<32x128xf32>
    %133 = vector.shape_cast %43 : vector<32x128xf32> to vector<1x32x128xf32>
    tpu.vector_store %arg2[%c2_43, %c0_44, %c0_45], %133 {strides = array<i32>} : memref<6x32x128xf32, #tpu.memory_space<vmem>>, vector<1x32x128xf32>,
    %c3_46 = arith.constant 3 : index
    %c0_47 = arith.constant 0 : index
    %c0_48 = arith.constant 0 : index
    %134 = vector.load %arg2[%c3_46, %c0_47, %c0_48] : memref<6x32x128xf32, #tpu.memory_space<vmem>>, vector<1x32x128xf32>
    %135 = vector.shape_cast %134 : vector<1x32x128xf32> to vector<32x128xf32>
    %136 = vector.shape_cast %109 : vector<32x128xf32> to vector<1x32x128xf32>
    tpu.vector_store %arg2[%c3_46, %c0_47, %c0_48], %136 {strides = array<i32>} : memref<6x32x128xf32, #tpu.memory_space<vmem>>, vector<1x32x128xf32>,
    %c4_49 = arith.constant 4 : index
    %c0_50 = arith.constant 0 : index
    %c0_51 = arith.constant 0 : index
    %137 = vector.load %arg2[%c4_49, %c0_50, %c0_51] : memref<6x32x128xf32, #tpu.memory_space<vmem>>, vector<1x32x128xf32>
    %138 = vector.shape_cast %137 : vector<1x32x128xf32> to vector<32x128xf32>
    %139 = vector.shape_cast %110 : vector<32x128xf32> to vector<1x32x128xf32>
    tpu.vector_store %arg2[%c4_49, %c0_50, %c0_51], %139 {strides = array<i32>} : memref<6x32x128xf32, #tpu.memory_space<vmem>>, vector<1x32x128xf32>,
    %c5_52 = arith.constant 5 : index
    %c0_53 = arith.constant 0 : index
    %c0_54 = arith.constant 0 : index
    %140 = vector.load %arg2[%c5_52, %c0_53, %c0_54] : memref<6x32x128xf32, #tpu.memory_space<vmem>>, vector<1x32x128xf32>
    %141 = vector.shape_cast %140 : vector<1x32x128xf32> to vector<32x128xf32>
    %142 = vector.shape_cast %111 : vector<32x128xf32> to vector<1x32x128xf32>
    tpu.vector_store %arg2[%c5_52, %c0_53, %c0_54], %142 {strides = array<i32>} : memref<6x32x128xf32, #tpu.memory_space<vmem>>, vector<1x32x128xf32>,
    %143 = arith.extui %123 : vector<32x128xi1> to vector<32x128xi32>
    %144 = arith.extui %124 : vector<32x128xi1> to vector<32x128xi32>
    %c2_i32 = arith.constant 2 : i32
    %145 = vector.broadcast %c2_i32 : i32 to vector<32x128xi32>
    %146 = arith.muli %145, %144 : vector<32x128xi32>
    %147 = arith.addi %143, %146 : vector<32x128xi32>
    %148 = arith.trunci %147 : vector<32x128xi32> to vector<32x128xi8>
    %c0_55 = arith.constant 0 : index
    %c0_56 = arith.constant 0 : index
    %149 = vector.load %arg3[%c0_55, %c0_56] : memref<32x128xi8, #tpu.memory_space<vmem>>, vector<32x128xi8>
    tpu.vector_store %arg3[%c0_55, %c0_56], %148 {strides = array<i32>} : memref<32x128xi8, #tpu.memory_space<vmem>>, vector<32x128xi8>,
    return
  }
  func.func @transform_0(%arg0: i32) -> (i32, i32, i32) {
    %c0_i32 = arith.constant 0 : i32
    %c0_i32_0 = arith.constant 0 : i32
    %c0_i32_1 = arith.constant 0 : i32
    return %c0_i32, %arg0, %c0_i32_0 : i32, i32, i32
  }
  func.func @transform_1(%arg0: i32) -> (i32, i32, i32) {
    %c0_i32 = arith.constant 0 : i32
    %c0_i32_0 = arith.constant 0 : i32
    %c0_i32_1 = arith.constant 0 : i32
    return %c0_i32, %arg0, %c0_i32_0 : i32, i32, i32
  }
  func.func @transform_2(%arg0: i32) -> (i32, i32) {
    %c0_i32 = arith.constant 0 : i32
    %c0_i32_0 = arith.constant 0 : i32
    return %arg0, %c0_i32 : i32, i32
  }
}

</mosaic_0001>

<bundles_post_ra>
// kernel: refractive_surface_forward_frame.1
= control target key start
LH: loop header
LB: loop body
LE: loop exit
PB: predicated region body
PF: predicated region fallthrough
CT: control target
= control target key end

     0   :  { %s1374_s0 = inlined_call_operand.vmem [shape: f32[6,32,128], index: 0, kind: input, shape index: {}]   ;;  %s1375_s1 = inlined_call_operand.vmem [shape: f32[6,32,128], index: 1, kind: output, shape index: {0}]   ;;  %s1376_s2 = inlined_call_operand.vmem [shape: s8[32,128], index: 2, kind: output, shape index: {1}]  }
   0x1   :  { %v577_v0 = vld [vmem:[%s1374_s0] sm:$0xff]  ;;  %v616_v11 = vld [vmem:[%s1374_s0 + $0x8] sm:$0xff]  ;;  %v656_v24 = vld [vmem:[%s1374_s0 + $0x10] sm:$0xff] }
   0x2   :  { %v582_v1 = vld [vmem:[%s1374_s0 + $0x20] sm:$0xff]  ;;  %v505_v6 = vadd.f32 -2.0, %v577_v0  ;;  %v621_v12 = vld [vmem:[%s1374_s0 + $0x28] sm:$0xff]  ;;  %v506_v19 = vadd.f32 -2.0, %v616_v11  ;;  %v661_v25 = vld [vmem:[%s1374_s0 + $0x30] sm:$0xff]  ;;  %v507_v34 = vadd.f32 -2.0, %v656_v24 }
   0x3   :  { %v587_v2 = vld [vmem:[%s1374_s0 + $0x40] sm:$0xff]  ;;  %v67_v7 = vmul.f32 %v582_v1, %v582_v1  ;;  %v626_v13 = vld [vmem:[%s1374_s0 + $0x48] sm:$0xff]  ;;  %v68_v20 = vmul.f32 %v621_v12, %v621_v12  ;;  %v666_v26 = vld [vmem:[%s1374_s0 + $0x50] sm:$0xff]  ;;  %v69_v37 = vmul.f32 %v661_v25, %v661_v25 }
   0x4   :  { %v592_v3 = vld [vmem:[%s1374_s0 + $0x60] sm:$0xff]  ;;  %v75_v10 = vmul.f32 %v587_v2, %v587_v2  ;;  %v63_v15 = vmul.f32 %v505_v6, %v505_v6  ;;  %v632_v16 = vld [vmem:[%s1374_s0 + $0x68] sm:$0xff]  ;;  %v76_v23 = vmul.f32 %v626_v13, %v626_v13  ;;  %v64_v30 = vmul.f32 %v506_v19, %v506_v19  ;;  %v672_v31 = vld [vmem:[%s1374_s0 + $0x70] sm:$0xff] }
   0x5   :  { %v597_v4 = vld [vmem:[%s1374_s0 + $0x80] sm:$0xff]  ;;  %v43_v14 = vmul.f32 %v505_v6, %v592_v3  ;;  %v637_v17 = vld [vmem:[%s1374_s0 + $0x88] sm:$0xff]  ;;  %v44_v29 = vmul.f32 %v506_v19, %v632_v16  ;;  %v677_v32 = vld [vmem:[%s1374_s0 + $0x90] sm:$0xff]  ;;  %v45_v44 = vmul.f32 %v507_v34, %v672_v31  ;;  %v65_v45 = vmul.f32 %v507_v34, %v507_v34 }
   0x6   :  { %v602_v5 = vld [vmem:[%s1374_s0 + $0xa0] sm:$0xff]  ;;  %v47_v8 = vmul.f32 %v597_v4, %v582_v1  ;;  %v642_v18 = vld [vmem:[%s1374_s0 + $0xa8] sm:$0xff]  ;;  %v48_v21 = vmul.f32 %v637_v17, %v621_v12  ;;  %v71_v28 = vadd.f32 %v67_v7, %v63_v15  ;;  %v682_v33 = vld [vmem:[%s1374_s0 + $0xb0] sm:$0xff]  ;;  %v49_v35 = vmul.f32 %v677_v32, %v661_v25 }
   0x7   :  { %v55_v9 = vmul.f32 %v602_v5, %v587_v2  ;;  %v56_v22 = vmul.f32 %v642_v18, %v626_v13  ;;  %v57_v36 = vmul.f32 %v682_v33, %v666_v26  ;;  %v694_v38 = vld [vmem:[%s1374_s0 + $0x18] sm:$0xff]  ;;  %v72_v42 = vadd.f32 %v68_v20, %v64_v30 }
   0x8   :  { %v51_v27 = vadd.f32 %v47_v8, %v43_v14  ;;  %v79_v40 = vadd.f32 %v75_v10, %v71_v28  ;;  %v52_v41 = vadd.f32 %v48_v21, %v44_v29  ;;  %v701_v43 = vld [vmem:[%s1374_s0 + $0x78] sm:$0xff]  ;;  %v77_v46 = vmul.f32 %v666_v26, %v666_v26 }
   0x9   :  { %v709_v47 = vld [vmem:[%s1374_s0 + $0x38] sm:$0xff]  ;;  %v508_v49 = vadd.f32 -2.0, %v694_v38  ;;  %v80_v55 = vadd.f32 %v76_v23, %v72_v42  ;;  %v53_v56 = vadd.f32 %v49_v35, %v45_v44  ;;  %v73_v57 = vadd.f32 %v69_v37, %v65_v45 }
   0xa   :  { %v696_v39 = vadd.f32 %v55_v9, %v51_v27  ;;  %v714_v48 = vld [vmem:[%s1374_s0 + $0x98] sm:$0xff]  ;;  %v509_v50 = vadd.f32 -4.0, %v79_v40  ;;  %v719_v52 = vadd.f32 %v56_v22, %v52_v41  ;;  %v70_v14 = vmul.f32 %v709_v47, %v709_v47 }
   0xb   :  { %v724_v53 = vld [vmem:[%s1374_s0 + $0x58] sm:$0xff]  ;;  %v46_v58 = vmul.f32 %v508_v49, %v701_v43  ;;  %v50_v61 = vmul.f32 %v714_v48, %v709_v47  ;;  %v510_v62 = vadd.f32 -4.0, %v80_v55  ;;  %v738_v63 = vadd.f32 %v57_v36, %v53_v56 }
   0xc   :  { %v87_v51 = vmul.f32 %v696_v39, %v696_v39  ;;  %v729_v54 = vld [vmem:[%s1374_s0 + $0xb8] sm:$0xff]  ;;  %v88_v60 = vmul.f32 %v719_v52, %v719_v52  ;;  %v81_v6 = vadd.f32 %v77_v46, %v73_v57  ;;  %v66_v10 = vmul.f32 %v508_v49, %v508_v49 }
   0xd   :  { %v58_v7 = vmul.f32 %v729_v54, %v724_v53  ;;  %v54_v9 = vadd.f32 %v50_v61, %v46_v58  ;;  %v89_v20 = vmul.f32 %v738_v63, %v738_v63  ;;  %v78_v28 = vmul.f32 %v724_v53, %v724_v53 }
   0xe   :  { %v732_v59 = vsub.f32 %v87_v51, %v509_v50  ;;  %v745_v15 = vsub.f32 %v88_v60, %v510_v62  ;;  %v511_v19 = vadd.f32 -4.0, %v81_v6  ;;  %v74_v27 = vadd.f32 %v70_v14, %v66_v10 }
   0xf   :  { %v752_v23 = vadd.f32 %v58_v7, %v54_v9  ;;  %v387_v29 = vlaneseq  ;;  %v763_v36 = vmul.f32 0.6666667, %v592_v3  ;;  %v131_v40 = vsub.f32 0.0, %v696_v39 }
  0x10   :  { %v99_v8 = vmax.f32 %v732_v59, 0.0  ;;  %v100_v21 = vmax.f32 %v745_v15, 0.0  ;;  %v750_v22 = vsub.f32 %v89_v20, %v511_v19  ;;  %v82_v34 = vadd.f32 %v78_v28, %v74_v27 }
  0x11   :  { %v90_v35 = vmul.f32 %v752_v23, %v752_v23  ;;  %v388_v37 = vshrl.u32 %v387_v29, 7  ;;  %v767_v42 = vmul.f32 0.6666667, %v632_v16  ;;  %v769_v44 = vand.u32 127, %v387_v29 }
  0x12   :  { %540 = vrsqrt.f32 %v99_v8  ;;  %v757_v30 = vmax.f32 %v750_v22, 0.0  ;;  %v512_v41 = vadd.f32 -4.0, %v82_v34  ;;  %vm105_vm0 = vcmp.eq.f32.partialorder %v99_v8, inf }
  0x13   :  { %542 = vrsqrt.f32 %v100_v21  ;;  %1381 = vst [vmem:[#allocation2_spill] sm:$0xff] %v767_v42  ;;  %vm107_vm1 = vcmp.eq.f32.partialorder %v99_v8, 0.0  ;;  %v132_v45 = vsub.f32 0.0, %v719_v52  ;;  %v133_v46 = vsub.f32 0.0, %v738_v63 }
  0x14   :  { %544 = vrsqrt.f32 %v757_v30  ;;  %v108_v49 = vand.u32 2147483648, %v99_v8  ;;  %v773_v50 = vsub.f32 %v90_v35, %v512_v41  ;;  %v776_v51 = vmul.f32 0.6666667, %v672_v31 }
  0x15   :  { %v779_v39 = vmul.f32 0.6666667, %v701_v43  ;;  %vm112_vm2 = vcmp.eq.f32.partialorder %v100_v21, inf  ;;  %vm114_vm3 = vcmp.eq.f32.partialorder %v100_v21, 0.0  ;;  %v115_v56 = vand.u32 2147483648, %v100_v21 }
  0x16   :  { %1382 = vst [vmem:[#allocation3_spill] sm:$0xff] %v776_v51  ;;  %v782_v57 = vmul.f32 0.6666667, %v597_v4  ;;  %v785_v52 = vmax.f32 %v773_v50, 0.0  ;;  %v789_v61 = vmul.f32 0.6666667, %v637_v17 }
  0x17   :  { %1383 = vst [vmem:[#allocation4_spill] sm:$0xff] %v779_v39  ;;  %vm119_vm4 = vcmp.eq.f32.partialorder %v757_v30, inf  ;;  %v793_v62 = vmul.f32 0.6666667, %v677_v32  ;;  %v796_v63 = vmul.f32 0.6666667, %v714_v48 }
  0x18   :  { %1384 = vst [vmem:[#allocation5_spill] sm:$0xff] %v789_v61  ;;  %v400_v6 = vmul.u32 128, %v388_v37  ;;  %vm121_vm5 = vcmp.eq.f32.partialorder %v757_v30, 0.0  ;;  %v122_v10 = vand.u32 2147483648, %v757_v30  ;;  %546 = vrsqrt.f32 %v785_v52 }
  0x19   :  { %1385 = vst [vmem:[#allocation6_spill] sm:$0xff] %v793_v62  ;;  %1386 = vst [vmem:[#allocation7_spill] sm:$0xff] %v796_v63  ;;  %v389_v20 = vadd.s32 8, %v388_v37  ;;  %v803_v27 = vadd.s32 16, %v388_v37  ;;  %v806_v29 = vmul.f32 0.6666667, %v602_v5 }
  0x1a   :  { %v809_v34 = vmul.f32 0.6666667, %v642_v18  ;;  %v811_v35 = vadd.s32 24, %v388_v37  ;;  %vm126_vm6 = vcmp.eq.f32.partialorder %v785_v52, inf  ;;  %vm128_vm7 = vcmp.eq.f32.partialorder %v785_v52, 0.0 }
  0x1b   :  { %1387 = vst [vmem:[#allocation8_spill] sm:$0xff] %v806_v29  ;;  %v401_v60 = vmul.u32 128, %v389_v20  ;;  %v402_v63 = vmul.u32 128, %v803_v27  ;;  %vm95_vm11 = vcmp.ge.f32.partialorder %v732_v59, 0.0 }
  0x1c   :  { %v541_v55 = vpop.eup %540  ;;  %1388 = vst [vmem:[#allocation9_spill] sm:$0xff] %v809_v34 }
  0x1d   :  { %v104_v58 = vmul.f32 %v541_v55, %v99_v8  ;;  %v543_v7 = vpop.eup %542 }
  0x1e   :  { %v111_v19 = vmul.f32 %v543_v7, %v100_v21  ;;  %v545_v41 = vpop.eup %544 }
  0x1f   :  { %v106_v9 = vsel %vm105_vm0, %v99_v8, %v104_v58  ;;  %v815_v58 = vmul.f32 0.6666667, %v682_v33  ;;  %v818_v8 = vmul.f32 0.6666667, %v729_v54 }
  0x20   :  { %v109_v14 = vsel %vm107_vm1, %v108_v49, %v106_v9  ;;  %v113_v55 = vsel %vm112_vm2, %v100_v21, %v111_v19  ;;  %v821_v49 = vadd.s32 %v400_v6, %v769_v44  ;;  %v118_v9 = vmul.f32 %v545_v41, %v757_v30 }
  0x21   :  { %v135_v28 = vsub.f32 %v131_v40, %v109_v14  ;;  %1389 = vst [vmem:[#allocation10_spill] sm:$0xff] %v815_v58  ;;  %1390 = vst [vmem:[#allocation11_spill] sm:$0xff] %v818_v8  ;;  %v116_v7 = vsel %vm114_vm3, %v115_v56, %v113_v55  ;;  %v403_v21 = vmul.u32 128, %v811_v35 }
  0x22   :  { %v136_v14 = vsub.f32 %v132_v45, %v116_v7  ;;  %v120_v6 = vsel %vm119_vm4, %v757_v30, %v118_v9  ;;  %vm408_vm14 = vcmp.lt.s32.totalorder %v821_v49, 256 }
  0x23   :  { %v139_v40 = vmul.f32 %v592_v3, %v135_v28  ;;  %v147_v37 = vmul.f32 %v597_v4, %v135_v28  ;;  %v155_v19 = vmul.f32 %v602_v5, %v135_v28  ;;  %v123_v45 = vsel %vm121_vm5, %v122_v10, %v120_v6 }
  0x24   :  { %v140_v56 = vmul.f32 %v632_v16, %v136_v14  ;;  %v148_v20 = vmul.f32 %v637_v17, %v136_v14 }
  0x25   :  { %v143_v39 = vadd.f32 %v139_v40, %v577_v0  ;;  %v834_v8 = vadd.f32 %v582_v1, %v147_v37  ;;  %v159_v27 = vadd.f32 %v587_v2, %v155_v19  ;;  %v137_v0 = vsub.f32 %v133_v46, %v123_v45  ;;  %v547_v46 = vpop.eup %546 }
  0x26   :  { %v144_v30 = vadd.f32 %v140_v56, %v616_v11  ;;  %v129_v2 = vand.u32 2147483648, %v785_v52  ;;  %v152_v10 = vadd.f32 %v621_v12, %v148_v20  ;;  %v125_v12 = vmul.f32 %v547_v46, %v785_v52 }
  0x27   :  { %v513_v28 = vadd.f32 -2.0, %v143_v39  ;;  %420 = vst [vmem:[%s1375_s1] sm:$0xff] %v143_v39  ;;  %v847_v1 = vmul.f32 0.5, %v834_v8  ;;  %517 = vst [vmem:[%s1375_s1 + $0x20] sm:$0xff] %v834_v8  ;;  %v856_v35 = vmul.f32 0.5, %v159_v27  ;;  %v141_v41 = vmul.f32 %v672_v31, %v137_v0 }
  0x28   :  { %521 = vst [vmem:[%s1375_s1 + $0x40] sm:$0xff] %v159_v27  ;;  %v149_v11 = vmul.f32 %v677_v32, %v137_v0  ;;  %v514_v40 = vadd.f32 -2.0, %v144_v30  ;;  %421 = vst [vmem:[%s1375_s1 + $0x8] sm:$0xff] %v144_v30  ;;  %v872_v7 = vmul.f32 0.5, %v152_v10  ;;  %v127_v45 = vsel %vm126_vm6, %v785_v52, %v125_v12 }
  0x29   :  { %v861_v39 = vmul.f32 0.5, %v513_v28  ;;  %v203_v55 = vmul.f32 %v597_v4, %v847_v1  ;;  %518 = vst [vmem:[%s1375_s1 + $0x28] sm:$0xff] %v152_v10  ;;  %v145_v37 = vadd.f32 %v141_v41, %v656_v24  ;;  %v211_v6 = vmul.f32 %v602_v5, %v856_v35 }
  0x2a   :  { %v153_v19 = vadd.f32 %v661_v25, %v149_v11  ;;  %v883_v56 = vmul.f32 0.5, %v514_v40  ;;  %v156_v20 = vmul.f32 %v642_v18, %v136_v14  ;;  %v890_v28 = vadd.s32 %v401_v60, %v769_v44 }
  0x2b   :  { %v199_v9 = vmul.f32 %v592_v3, %v861_v39  ;;  %v515_v30 = vadd.f32 -2.0, %v145_v37  ;;  %422 = vst [vmem:[%s1375_s1 + $0x10] sm:$0xff] %v145_v37  ;;  %v130_v24 = vsel %vm128_vm7, %v129_v2, %v127_v45  ;;  %v204_v46 = vmul.f32 %v637_v17, %v872_v7 }
  0x2c   :  { %519 = vst [vmem:[%s1375_s1 + $0x30] sm:$0xff] %v153_v19  ;;  %v200_v52 = vmul.f32 %v632_v16, %v883_v56  ;;  %v1391_v60 = vsub.f32 0.0, %v752_v23  ;;  %v904_v41 = vmul.f32 0.5, %v153_v19  ;;  %v160_v11 = vadd.f32 %v626_v13, %v156_v20 }
  0x2d   :  { %v207_v25 = vadd.f32 %v203_v55, %v199_v9  ;;  %v907_v40 = vmul.f32 0.5, %v515_v30  ;;  %v157_v55 = vmul.f32 %v682_v33, %v137_v0  ;;  %v911_v12 = vadd.s32 %v402_v63, %v769_v44 }
  0x2e   :  { %v138_v14 = vsub.f32 %v1391_v60, %v130_v24  ;;  %v205_v37 = vmul.f32 %v677_v32, %v904_v41  ;;  %522 = vst [vmem:[%s1375_s1 + $0x48] sm:$0xff] %v160_v11  ;;  %v921_v13 = vadd.s32 %v403_v21, %v769_v44  ;;  %v925_v45 = vmul.f32 0.5, %v160_v11 }
  0x2f   :  { %v215_v2 = vadd.f32 %v211_v6, %v207_v25  ;;  %v201_v0 = vmul.f32 %v672_v31, %v907_v40  ;;  %v208_v6 = vadd.f32 %v204_v46, %v200_v52  ;;  %v161_v24 = vadd.f32 %v666_v26, %v157_v55 }
  0x30   :  { %v142_v9 = vmul.f32 %v701_v43, %v138_v14  ;;  %v150_v23 = vmul.f32 %v714_v48, %v138_v14  ;;  %v158_v25 = vmul.f32 %v729_v54, %v138_v14  ;;  %v163_v60 = vmul.f32 %v834_v8, %v834_v8 }
  0x31   :  { %v219_v63 = vsub.f32 0.0, %v215_v2  ;;  %v167_v44 = vmul.f32 %v159_v27, %v159_v27  ;;  %v212_v21 = vmul.f32 %v642_v18, %v925_v45  ;;  %523 = vst [vmem:[%s1375_s1 + $0x50] sm:$0xff] %v161_v24  ;;  %v948_v8 = vmul.f32 0.5, %v161_v24 }
  0x32   :  { %v146_v20 = vadd.f32 %v142_v9, %v694_v38  ;;  %v154_v30 = vadd.f32 %v709_v47, %v150_v23  ;;  %v938_v38 = vmul.f32 %v152_v10, %v152_v10  ;;  %v209_v47 = vadd.f32 %v205_v37, %v201_v0 }
  0x33   :  { %vm223_vm8 = vcmp.lt.f32.partialorder %v219_v63, 0.0  ;;  %v216_v26 = vadd.f32 %v212_v21, %v208_v6  ;;  %v162_v27 = vadd.f32 %v724_v53, %v158_v25  ;;  %v556_v14 = vmov 1.0  }
  0x34   :  { %v516_v46 = vadd.f32 -2.0, %v146_v20  ;;  %423 = vst [vmem:[%s1375_s1 + $0x18] sm:$0xff] %v146_v20  ;;  %v940_v52 = vmul.f32 0.5, %v154_v30  ;;  %520 = vst [vmem:[%s1375_s1 + $0x38] sm:$0xff] %v154_v30  ;;  %v951_v2 = vsel %vm223_vm8, -1.0, %v556_v14  ;;  %v955_v55 = vmul.f32 %v153_v19, %v153_v19 }
  0x35   :  { %v243_v37 = vmul.f32 %v951_v2, %v219_v63  ;;  %v220_v23 = vsub.f32 0.0, %v216_v26  ;;  %v213_v0 = vmul.f32 %v682_v33, %v948_v8  ;;  %v962_v6 = vmul.f32 0.5, %v162_v27  ;;  %524 = vst [vmem:[%s1375_s1 + $0x58] sm:$0xff] %v162_v27 }
  0x36   :  { %v953_v10 = vmul.f32 0.5, %v516_v46  ;;  %v206_v9 = vmul.f32 %v714_v48, %v940_v52  ;;  %v967_v53 = vadd.f32 %v167_v44, %v163_v60  ;;  %v973_v20 = vmul.f32 %v951_v2, %v861_v39 }
  0x37   :  { %v247_v63 = vmul.f32 %v243_v37, %v243_v37  ;;  %v975_v25 = vmul.f32 2.0, %v243_v37  ;;  %v217_v21 = vadd.f32 %v213_v0, %v209_v47  ;;  %v214_v46 = vmul.f32 %v729_v54, %v962_v6 }
  0x38   :  { %v202_v19 = vmul.f32 %v701_v43, %v953_v10  ;;  %vm224_vm9 = vcmp.lt.f32.partialorder %v220_v23, 0.0  ;;  %v981_v26 = vmul.f32 %v951_v2, %v847_v1  ;;  %v983_v44 = vmul.f32 %v160_v11, %v160_v11 }
  0x39   :  { %v251_v58 = vsub.f32 1.0, %v247_v63  ;;  %v985_v62 = vsel %vm224_vm9, -1.0, %v556_v14  ;;  %v987_v39 = vmul.f32 %v154_v30, %v154_v30  ;;  %v989_v51 = vmul.f32 %v161_v24, %v161_v24 }
  0x3a   :  { %v210_v60 = vadd.f32 %v206_v9, %v202_v19  ;;  %v221_v34 = vsub.f32 0.0, %v217_v21  ;;  %v244_v47 = vmul.f32 %v985_v62, %v220_v23  ;;  %v347_v42 = vmul.f32 %v975_v25, %v973_v20 }
  0x3b   :  { %1392 = vst [vmem:[#allocation12_spill] sm:$0xff] %v987_v39  ;;  %v255_v61 = vmul.f32 0.44444445, %v251_v58  ;;  %v996_v1 = vmul.f32 %v985_v62, %v883_v56  ;;  %v355_v30 = vmul.f32 %v975_v25, %v981_v26  ;;  %vm175_vm12 = vcmp.le.f32.partialorder %v967_v53, 0.5625 }
  0x3c   :  { %v218_v0 = vadd.f32 %v214_v46, %v210_v60  ;;  %v248_v11 = vmul.f32 %v244_v47, %v244_v47  ;;  %v998_v9 = vmul.f32 2.0, %v244_v47  ;;  %vm225_vm10 = vcmp.lt.f32.partialorder %v221_v34, 0.0  ;;  %vm1068_vm4 = vmand %vm95_vm11, %vm175_vm12 }
  0x3d   :  { %1393 = vst [vmem:[#allocation13_spill] sm:$0xff] %v996_v1  ;;  %v259_v58 = vsub.f32 1.0, %v255_v61  ;;  %v229_v23 = vsel %vm225_vm10, -1.0, %v556_v14  ;;  %v1006_v19 = vmul.f32 %v985_v62, %v872_v7  ;;  %v1008_v56 = vmul.f32 %v162_v27, %v162_v27  ;;  %vm1107_vm10 = vmand %vm1068_vm4, %vm408_vm14 }
  0x3e   :  { %v222_v24 = vsub.f32 0.0, %v218_v0  ;;  %v1010_v63 = vmul.f32 0.6666667, %v243_v37  ;;  %v252_v21 = vsub.f32 1.0, %v248_v11  ;;  %v245_v46 = vmul.f32 %v229_v23, %v221_v34 }
  0x3f   :  { %1394 = vst [vmem:[#allocation14_spill] sm:$0xff] %v1006_v19  ;;  %1395 = vst [vmem:[#allocation15_spill] sm:$0xff] %v1008_v56  ;;  %v1012_v60 = vmax.f32 %v259_v58, 0.0  ;;  %v1015_v39 = vadd.f32 %v592_v3, %v347_v42  ;;  %v348_v0 = vmul.f32 %v998_v9, %v996_v1  ;;  %v1019_v29 = vmul.f32 0.6666667, %v244_v47 }
  0x40   :  { %vm226_vm13 = vcmp.lt.f32.partialorder %v222_v24, 0.0  ;;  %v256_v61 = vmul.f32 0.44444445, %v252_v21  ;;  %v249_v7 = vmul.f32 %v245_v46, %v245_v46  ;;  %v1022_v27 = vadd.f32 %v597_v4, %v355_v30 }
  0x41   :  { %vm1025_vm15 = vcmp.lt.f32.partialorder %v259_v58, 0.0  ;;  %548 = vrsqrt.f32 %v1012_v60  ;;  %v1031_v3 = vmul.f32 %v229_v23, %v907_v40  ;;  %v356_v42 = vmul.f32 %v998_v9, %v1006_v19 }
  0x42   :  { %v260_v37 = vsub.f32 1.0, %v256_v61  ;;  %v253_v47 = vsub.f32 1.0, %v249_v7  ;;  %v345_v11 = vmul.f32 2.0, %v245_v46  ;;  %v230_v21 = vsel %vm226_vm13, -1.0, %v556_v14 }
  0x43   :  { %1398 = vst [vmem:[#allocation16_spill] sm:$0xff] %v1031_v3  ;;  %v1036_v4 = vadd.f32 %v632_v16, %v348_v0  ;;  %v1038_v30 = vmul.f32 0.6666667, %v245_v46  ;;  %v246_v58 = vmul.f32 %v230_v21, %v222_v24  ;;  %v1041_v56 = vmul.f32 %v229_v23, %v904_v41 }
  0x44   :  { %vm273_vm0 = vcmp.eq.f32.partialorder %v1012_v60, inf  ;;  %v1044_v40 = vmax.f32 %v260_v37, 0.0  ;;  %v257_v1 = vmul.f32 0.44444445, %v253_v47  ;;  %v1047_v19 = vmul.f32 %v230_v21, %v953_v10 }
  0x45   :  { %vm275_vm1 = vcmp.eq.f32.partialorder %v1012_v60, 0.0  ;;  %v276_v14 = vand.u32 2147483648, %v1012_v60  ;;  %v250_v16 = vmul.f32 %v246_v58, %v246_v58  ;;  %v346_v0 = vmul.f32 2.0, %v246_v58 }
  0x46   :  { %1399 = vst [vmem:[#allocation17_spill] sm:$0xff] %v1047_v19  ;;  %vm409_vm2 = vcmp.lt.s32.totalorder %v890_v28, 256  ;;  %vm1052_vm3 = vcmp.lt.f32.partialorder %v260_v37, 0.0  ;;  %550 = vrsqrt.f32 %v1044_v40  ;;  %v349_v41 = vmul.f32 %v345_v11, %v1031_v3 }
  0x47   :  { %v1059_v46 = vadd.f32 %v637_v17, %v356_v42  ;;  %v261_v10 = vsub.f32 1.0, %v257_v1  ;;  %v254_v61 = vsub.f32 1.0, %v250_v16  ;;  %v1061_v7 = vmul.f32 0.6666667, %v246_v58 }
  0x48   :  { %v357_v47 = vmul.f32 %v345_v11, %v1041_v56  ;;  %vm280_vm5 = vcmp.eq.f32.partialorder %v1044_v40, inf  ;;  %v350_v3 = vmul.f32 %v346_v0, %v1047_v19  ;;  %v1075_v17 = vmul.f32 %v230_v21, %v940_v52 }
  0x49   :  { %v239_v1 = vmul.f32 %v951_v2, %v856_v35  ;;  %v1081_v42 = vmul.f32 %v985_v62, %v925_v45  ;;  %vm557_vm6 = vmmov 1   ;;  %vm282_vm8 = vcmp.eq.f32.partialorder %v1044_v40, 0.0 }
  0x4a   :  { %vm1086_vm7 = vmxor %vm1025_vm15, %vm557_vm6  ;;  %v283_v52 = vand.u32 2147483648, %v1044_v40  ;;  %v1092_v53 = vmax.f32 %v261_v10, 0.0  ;;  %v258_v58 = vmul.f32 0.44444445, %v254_v61  ;;  %vm410_vm9 = vcmp.lt.s32.totalorder %v911_v12, 256 }
  0x4b   :  { %v1096_v62 = vadd.f32 %v672_v31, %v349_v41  ;;  %v358_v35 = vmul.f32 %v346_v0, %v1075_v17  ;;  %v363_v45 = vmul.f32 %v975_v25, %v239_v1  ;;  %v1101_v2 = vmul.f32 %v229_v23, %v948_v8  ;;  %v549_v61 = vpop.eup %548  ;;  %vm1125_vm12 = vmand %vm1086_vm7, %vm408_vm14 }
  0x4c   :  { %vm1111_vm11 = vcmp.lt.f32.partialorder %v261_v10, 0.0  ;;  %552 = vrsqrt.f32 %v1092_v53  ;;  %v1117_v31 = vadd.f32 %v677_v32, %v357_v47  ;;  %v364_v8 = vmul.f32 %v998_v9, %v1081_v42  ;;  %vm1147_vm14 = vmxor %vm1052_vm3, %vm557_vm6 }
  0x4d   :  { %vm96_vm13 = vcmp.ge.f32.partialorder %v745_v15, 0.0  ;;  %v272_v23 = vmul.f32 %v549_v61, %v1012_v60  ;;  %v290_v41 = vand.u32 2147483648, %v1092_v53  ;;  %v262_v10 = vsub.f32 1.0, %v258_v58 }
  0x4e   :  { %v1133_v32 = vadd.f32 %v701_v43, %v350_v3  ;;  %v1137_v49 = vadd.f32 %v714_v48, %v358_v35  ;;  %v367_v9 = vadd.f32 %v602_v5, %v363_v45  ;;  %v365_v47 = vmul.f32 %v345_v11, %v1101_v2 }
  0x4f   :  { %v1142_v37 = vmul.f32 %v230_v21, %v962_v6  ;;  %vm97_vm7 = vcmp.ge.f32.partialorder %v750_v22, 0.0  ;;  %v274_v43 = vsel %vm273_vm0, %v1012_v60, %v272_v23  ;;  %v1156_v5 = vmax.f32 %v262_v10, 0.0 }
  0x50   :  { %v558_v48 = vmov 0   ;;  %v277_v11 = vsel %vm275_vm1, %v276_v14, %v274_v43  ;;  %v1167_v21 = vadd.f32 %v642_v18, %v364_v8  ;;  %vm411_vm0 = vcmp.lt.s32.totalorder %v921_v13, 256  ;;  %v551_v45 = vpop.eup %550  ;;  %vm417_vm1 = vmand %vm1147_vm14, %vm409_vm2  ;;  %v1437_v13 = vld [vmem:[#allocation17_spill] sm:$0xff] }
  0x51   :  { %v449_v6 = vsel %vm1107_vm10, 1, %v558_v48  ;;  %v453_v3 = vsel %vm1125_vm12, 1, %v558_v48  ;;  %v366_v58 = vmul.f32 %v346_v0, %v1142_v37  ;;  %v303_v61 = vsub.f32 %v1010_v63, %v277_v11  ;;  %vm1192_vm10 = vmxor %vm1111_vm11, %vm557_vm6 }
  0x52   :  { %v457_v35 = vmul.u32 2, %v453_v3  ;;  %vm1172_vm4 = vcmp.lt.f32.partialorder %v262_v10, 0.0  ;;  %554 = vrsqrt.f32 %v1156_v5  ;;  %v1178_v60 = vadd.f32 %v682_v33, %v365_v47 }
  0x53   :  { %v279_v18 = vmul.f32 %v551_v45, %v1044_v40  ;;  %v297_v14 = vand.u32 2147483648, %v1156_v5  ;;  %v1187_v63 = vadd.f32 %v729_v54, %v366_v58  ;;  %v311_v33 = vmul.f32 %v303_v61, %v973_v20  ;;  %v1423_v58 = vld [vmem:[#allocation13_spill] sm:$0xff] }
  0x54   :  { %v461_v0 = vadd.s32 %v457_v35, %v449_v6  ;;  %v323_v25 = vmul.f32 %v303_v61, %v981_v26  ;;  %v335_v23 = vmul.f32 %v303_v61, %v239_v1  ;;  %v172_v10 = vadd.f32 %v983_v44, %v938_v38  ;;  %v1418_v44 = vld [vmem:[#allocation8_spill] sm:$0xff]  ;;  %v1427_v61 = vld [vmem:[#allocation15_spill] sm:$0xff] }
  0x55   :  { %v281_v54 = vsel %vm280_vm5, %v1044_v40, %v279_v18  ;;  %vm296_vm14 = vcmp.eq.f32.partialorder %v1156_v5, 0.0  ;;  %v454_v59 = vsel %vm417_vm1, 1, %v558_v48  ;;  %v173_v20 = vadd.f32 %v989_v51, %v955_v55  ;;  %vm1218_vm5 = vmand %vm1192_vm10, %vm410_vm9 }
  0x56   :  { %v465_v47 = vpack.c.b16 %v461_v0, %v461_v0  ;;  %vm98_vm12 = vcmp.ge.f32.partialorder %v773_v50, 0.0  ;;  %v315_v26 = vadd.f32 %v311_v33, %v763_v36  ;;  %v284_v1 = vsel %vm282_vm8, %v283_v52, %v281_v54  ;;  %v553_v51 = vpop.eup %552  ;;  %vm1226_vm8 = vmxor %vm1172_vm4, %vm557_vm6  ;;  %v1428_v0 = vld [vmem:[#allocation2_spill] sm:$0xff]  ;;  %v1430_v33 = vld [vmem:[#allocation5_spill] sm:$0xff] }
  0x57   :  { %v327_v38 = vadd.f32 %v323_v25, %v782_v57  ;;  %v339_v43 = vadd.f32 %v335_v23, %v1418_v44  ;;  %v304_v55 = vsub.f32 %v1019_v29, %v284_v1  ;;  %vm176_vm1 = vcmp.le.f32.partialorder %v172_v10, 0.5625  ;;  %v1431_v23 = vld [vmem:[#allocation9_spill] sm:$0xff] }
  0x58   :  { %v466_v3 = vpack.c.b8 %v465_v47, %v465_v47  ;;  %v458_v36 = vmul.u32 2, %v454_v59  ;;  %v371_v40 = vsel %vm1025_vm15, %v1015_v39, %v315_v26  ;;  %v286_v52 = vmul.f32 %v553_v51, %v1092_v53  ;;  %vm180_vm10 = vmand %vm96_vm13, %vm176_vm1  ;;  %v1424_v39 = vld [vmem:[#allocation14_spill] sm:$0xff]  ;;  %v1432_v26 = vld [vmem:[#allocation16_spill] sm:$0xff] }
  0x59   :  { %v375_v29 = vsel %vm1025_vm15, %v1022_v27, %v327_v38  ;;  %v379_v11 = vsel %vm1025_vm15, %v367_v9, %v339_v43  ;;  %525 = vst [vmem:[%s1375_s1 + $0x60] sm:$0xff] %v371_v40  ;;  %v312_v35 = vmul.f32 %v304_v55, %v1423_v58  ;;  %v324_v45 = vmul.f32 %v304_v55, %v1424_v39  ;;  %vm413_vm15 = vmand %vm180_vm10, %vm409_vm2  ;;  %v1426_v9 = vld [vmem:[#allocation12_spill] sm:$0xff]  ;;  %v1434_v43 = vld [vmem:[#allocation3_spill] sm:$0xff] }
  0x5a   :  { %529 = vst [vmem:[%s1375_s1 + $0x80] sm:$0xff] %v375_v29  ;;  %533 = vst [vmem:[%s1375_s1 + $0xa0] sm:$0xff] %v379_v11  ;;  %v336_v27 = vmul.f32 %v304_v55, %v1081_v42  ;;  %vm177_vm6 = vcmp.le.f32.partialorder %v173_v20, 0.5625  ;;  %vm1425_vm13 = vcmp.eq.f32.partialorder %v1092_v53, inf  ;;  %v450_v34 = vsel %vm413_vm15, 1, %v558_v48  ;;  %v1435_v51 = vld [vmem:[#allocation6_spill] sm:$0xff] }
  0x5b   :  { %473 = vst [vmem:[%s1376_s2] sm:$0x3] %v466_v3  ;;  %v288_v15 = vsel %vm1425_vm13, %v1092_v53, %v286_v52  ;;  %vm181_vm1 = vmand %vm97_vm7, %vm177_vm6  ;;  %v455_v42 = vsel %vm1218_vm5, 1, %v558_v48  ;;  %v174_v18 = vadd.f32 %v1427_v61, %v1426_v9  ;;  %v316_v28 = vadd.f32 %v312_v35, %v1428_v0  ;;  %v1436_v3 = vld [vmem:[#allocation10_spill] sm:$0xff]  ;;  %v1439_v58 = vld [vmem:[#allocation7_spill] sm:$0xff] }
  0x5c   :  { %vm1429_vm2 = vcmp.eq.f32.partialorder %v1092_v53, 0.0  ;;  %v328_v25 = vadd.f32 %v324_v45, %v1430_v33  ;;  %v340_v10 = vadd.f32 %v336_v27, %v1431_v23  ;;  %vm414_vm7 = vmand %vm181_vm1, %vm410_vm9  ;;  %v555_v22 = vpop.eup %554  ;;  %v462_v47 = vadd.s32 %v458_v36, %v450_v34  ;;  %v1440_v39 = vld [vmem:[#allocation11_spill] sm:$0xff] }
  0x5d   :  { %v291_v8 = vsel %vm1429_vm2, %v290_v41, %v288_v15  ;;  %v451_v59 = vsel %vm414_vm7, 1, %v558_v48  ;;  %v459_v20 = vmul.u32 2, %v455_v42  ;;  %vm419_vm5 = vmand %vm1226_vm8, %vm411_vm0  ;;  %v372_v53 = vsel %vm1052_vm3, %v1036_v4, %v316_v28 }
  0x5e   :  { %v305_v54 = vsub.f32 %v1038_v30, %v291_v8  ;;  %v293_v41 = vmul.f32 %v555_v22, %v1156_v5  ;;  %v376_v12 = vsel %vm1052_vm3, %v1059_v46, %v328_v25  ;;  %v380_v30 = vsel %vm1052_vm3, %v1167_v21, %v340_v10  ;;  %526 = vst [vmem:[%s1375_s1 + $0x68] sm:$0xff] %v372_v53 }
  0x5f   :  { %530 = vst [vmem:[%s1375_s1 + $0x88] sm:$0xff] %v376_v12  ;;  %534 = vst [vmem:[%s1375_s1 + $0xa8] sm:$0xff] %v380_v30  ;;  %v467_v24 = vpack.c.b16 %v462_v47, %v462_v47  ;;  %vm1433_vm3 = vcmp.eq.f32.partialorder %v1156_v5, inf  ;;  %v463_v38 = vadd.s32 %v459_v20, %v451_v59  ;;  %vm178_vm9 = vcmp.le.f32.partialorder %v174_v18, 0.5625 }
  0x60   :  { %v313_v1 = vmul.f32 %v305_v54, %v1432_v26  ;;  %v325_v4 = vmul.f32 %v305_v54, %v1041_v56  ;;  %v337_v46 = vmul.f32 %v305_v54, %v1101_v2  ;;  %v295_v21 = vsel %vm1433_vm3, %v1156_v5, %v293_v41  ;;  %vm182_vm8 = vmand %vm98_vm12, %vm178_vm9 }
  0x61   :  { %v456_v44 = vsel %vm419_vm5, 1, %v558_v48  ;;  %v298_v56 = vsel %vm296_vm14, %v297_v14, %v295_v21  ;;  %v468_v57 = vpack.c.b8 %v467_v24, %v467_v24  ;;  %v469_v40 = vpack.c.b16 %v463_v38, %v463_v38  ;;  %vm415_vm10 = vmand %vm182_vm8, %vm411_vm0 }
  0x62   :  { %v317_v6 = vadd.f32 %v313_v1, %v1434_v43  ;;  %v329_v55 = vadd.f32 %v325_v4, %v1435_v51  ;;  %v341_v2 = vadd.f32 %v337_v46, %v1436_v3  ;;  %v306_v36 = vsub.f32 %v1061_v7, %v298_v56 }
  0x63   :  { %v460_v52 = vmul.u32 2, %v456_v44  ;;  %v452_v7 = vsel %vm415_vm10, 1, %v558_v48  ;;  %474 = vst [vmem:[%s1376_s2 + $0x2] sm:$0x3] %v468_v57 }
  0x64   :  { %v373_v5 = vsel %vm1111_vm11, %v1096_v62, %v317_v6  ;;  %v377_v14 = vsel %vm1111_vm11, %v1117_v31, %v329_v55  ;;  %v381_v50 = vsel %vm1111_vm11, %v1178_v60, %v341_v2  ;;  %v314_v29 = vmul.f32 %v306_v36, %v1437_v13  ;;  %v1438_v60 = vld [vmem:[#allocation4_spill] sm:$0xff] }
  0x65   :  { %527 = vst [vmem:[%s1375_s1 + $0x70] sm:$0xff] %v373_v5  ;;  %531 = vst [vmem:[%s1375_s1 + $0x90] sm:$0xff] %v377_v14  ;;  %v326_v62 = vmul.f32 %v306_v36, %v1075_v17  ;;  %v338_v19 = vmul.f32 %v306_v36, %v1142_v37  ;;  %v470_v31 = vpack.c.b8 %v469_v40, %v469_v40 }
  0x66   :  { %535 = vst [vmem:[%s1375_s1 + $0xb0] sm:$0xff] %v381_v50  ;;  %v464_v48 = vadd.s32 %v460_v52, %v452_v7  ;;  %v318_v11 = vadd.f32 %v314_v29, %v1438_v60 }
  0x67   :  { %v330_v35 = vadd.f32 %v326_v62, %v1439_v58  ;;  %v342_v45 = vadd.f32 %v338_v19, %v1440_v39  ;;  %475 = vst [vmem:[%s1376_s2 + $0x4] sm:$0x3] %v470_v31 }
  0x68   :  { %v471_v17 = vpack.c.b16 %v464_v48, %v464_v48  ;;  %v374_v37 = vsel %vm1172_vm4, %v1133_v32, %v318_v11 }
  0x69   :  { %v378_v27 = vsel %vm1172_vm4, %v1137_v49, %v330_v35  ;;  %v382_v15 = vsel %vm1172_vm4, %v1187_v63, %v342_v45  ;;  %528 = vst [vmem:[%s1375_s1 + $0x78] sm:$0xff] %v374_v37 }
  0x6a   :  { %532 = vst [vmem:[%s1375_s1 + $0x98] sm:$0xff] %v378_v27  ;;  %536 = vst [vmem:[%s1375_s1 + $0xb8] sm:$0xff] %v382_v15  ;;  %v472_v32 = vpack.c.b8 %v471_v17, %v471_v17 }
  0x6c   :  { %476 = vst [vmem:[%s1376_s2 + $0x6] sm:$0x3] %v472_v32 }

</bundles_post_ra>
